<compile_context>
chip_gen: v7x
topology: tpu7x:2x2x1
jax: 0.10.0
libtpu: 0.0.40
codegen_flags: <defaults>
</compile_context>

<pallas_src>
import functools

import jax
import jax.numpy as jnp
import numpy as np
from jax.experimental import pallas as pl
from jax.experimental.pallas import tpu as pltpu


def _se_kernel(x_ref, w1t_ref, b1_ref, w2t_ref, b2_ref, o_ref, *, inv_hw):
    """Fused SE block for a block of NB batch elements.

    x_ref  : (NB, C, HW)  feature map (native dtype; channels on sublanes,
                          pixels on lanes)
    w1t_ref: (C, Cr)      squeeze weight, BN1 scale folded in, pre-transposed
    b1_ref : (1, Cr)      folded BN1 bias
    w2t_ref: (Cr, C)      excite weight, BN2 scale folded in, pre-transposed
    b2_ref : (1, C)       folded BN2 bias
    o_ref  : (NB, C, HW)  output = x * gate
    """
    # AdaptiveAvgPool2d(1): mean over pixels, accumulated in f32 (no whole-tile
    # upcast of x).
    pooled = jnp.sum(x_ref[...], axis=-1, dtype=jnp.float32) * inv_hw  # (NB, C)

    # Squeeze: 1x1 conv (BN1 scale pre-folded) + bias + ReLU.
    h = jnp.dot(pooled, w1t_ref[...], preferred_element_type=jnp.float32)
    h = jnp.maximum(h + b1_ref[...], 0.0)                              # (NB, Cr)

    # Excite: 1x1 conv (BN2 scale pre-folded) + bias + hsigmoid.
    g = jnp.dot(h, w2t_ref[...], preferred_element_type=jnp.float32)
    g = g + b2_ref[...]                                                # (NB, C)
    g = jnp.clip(g + 3.0, 0.0, 6.0) * (1.0 / 6.0)

    # Per-(n, c) gate broadcast over lanes; multiply in x's native dtype.
    gate = g[:, :, None].astype(x_ref.dtype)
    o_ref[...] = (x_ref[...] * gate).astype(o_ref.dtype)


def _fold_bn(gamma, beta, mean, var, eps):
    s = gamma / jnp.sqrt(var + eps)
    b = beta - mean * s
    return s, b


def _pick_nb(n, per_elem_block_bytes, target_block_bytes=4 << 20):
    """Largest divisor of n such that one x block stays near the ~4 MiB sweet
    spot and the grid has >= 2 steps when n >= 2 (keeps both v7x TCs busy)."""
    nb_max = max(1, target_block_bytes // max(per_elem_block_bytes, 1))
    if n >= 2:
        nb_max = min(nb_max, n // 2)
    nb_max = max(1, min(nb_max, n))
    nb = 1
    for d in range(1, nb_max + 1):
        if n % d == 0:
            nb = d
    return nb


def se_module(x, w1, bn1, w2, bn2, *, eps=1e-5):
    """Forward pass of SeModule: x * hsigmoid(BN2(W2 relu(BN1(W1 avgpool(x))))).

    x  : (N, C, H, W)
    w1 : (C//r, C)    first 1x1 conv weight (squeezed to 2-D, bias=False)
    bn1: (gamma, beta, running_mean, running_var), each (C//r,)
    w2 : (C, C//r)    second 1x1 conv weight (bias=False)
    bn2: (gamma, beta, running_mean, running_var), each (C,)

    BatchNorm is applied in inference mode (running stats folded into the conv
    weights / a per-channel bias), as is standard when exporting the module.
    """
    N, C, H, W = x.shape
    Cr = w1.shape[0]
    HW = H * W
    itemsize = jnp.dtype(x.dtype).itemsize

    # Fold BN scale into the conv weights; keep only the biases as extra inputs.
    s1, b1 = _fold_bn(*[a.astype(jnp.float32) for a in bn1], eps)
    s2, b2 = _fold_bn(*[a.astype(jnp.float32) for a in bn2], eps)
    w1t = (w1.astype(jnp.float32) * s1[:, None]).T   # (C, Cr)
    w2t = (w2.astype(jnp.float32) * s2[:, None]).T   # (Cr, C)
    b1r = b1.reshape(1, Cr)
    b2r = b2.reshape(1, C)

    # Flatten spatial dims (metadata-only for NCHW input); lane axis = H*W.
    x2 = x.reshape(N, C, HW)

    nb = _pick_nb(N, C * HW * itemsize)
    grid = (N // nb,)

    kernel = functools.partial(_se_kernel, inv_hw=1.0 / HW)

    cost = pl.CostEstimate(
        flops=4 * N * C * Cr,
        transcendentals=0,
        bytes_accessed=2 * N * C * HW * itemsize,
    )

    out = pl.pallas_call(
        kernel,
        out_shape=jax.ShapeDtypeStruct((N, C, HW), x.dtype),
        grid=grid,
        in_specs=[
            pl.BlockSpec((nb, C, HW), lambda n: (n, 0, 0)),
            pl.BlockSpec((C, Cr), lambda n: (0, 0)),
            pl.BlockSpec((1, Cr), lambda n: (0, 0)),
            pl.BlockSpec((Cr, C), lambda n: (0, 0)),
            pl.BlockSpec((1, C), lambda n: (0, 0)),
        ],
        out_specs=pl.BlockSpec((nb, C, HW), lambda n: (n, 0, 0)),
        compiler_params=pltpu.CompilerParams(
            dimension_semantics=("parallel",),
            vmem_limit_bytes=48 * 1024 * 1024,
        ),
        cost_estimate=cost,
    )(x2, w1t, b1r, w2t, b2r)

    return out.reshape(N, C, H, W)


def _reference_se(x, w1, bn1, w2, bn2, eps=1e-5):
    """Pure-numpy reference matching SeModule.forward (eval-mode BN)."""
    x = np.asarray(x, dtype=np.float64)
    w1 = np.asarray(w1, dtype=np.float64)
    w2 = np.asarray(w2, dtype=np.float64)
    g1, be1, m1, v1 = [np.asarray(a, dtype=np.float64) for a in bn1]
    g2, be2, m2, v2 = [np.asarray(a, dtype=np.float64) for a in bn2]

    pooled = x.mean(axis=(2, 3))                       # (N, C)
    h = pooled @ w1.T                                  # (N, Cr)
    h = (h - m1) / np.sqrt(v1 + eps) * g1 + be1
    h = np.maximum(h, 0.0)
    g = h @ w2.T                                       # (N, C)
    g = (g - m2) / np.sqrt(v2 + eps) * g2 + be2
    g = np.clip(g + 3.0, 0.0, 6.0) / 6.0               # hsigmoid
    return x * g[:, :, None, None]


if __name__ == "__main__":
    # SeModule(in_size=32, reduction=4) on a small (2, 32, 16, 16) feature map.
    N, C, H, W = 2, 32, 16, 16
    reduction = 4
    Cr = C // reduction

    key = jax.random.PRNGKey(0)
    ks = jax.random.split(key, 11)
    x = jax.random.normal(ks[0], (N, C, H, W), dtype=jnp.float32)
    w1 = 0.2 * jax.random.normal(ks[1], (Cr, C), dtype=jnp.float32)
    w2 = 0.2 * jax.random.normal(ks[2], (C, Cr), dtype=jnp.float32)
    bn1 = (
        1.0 + 0.1 * jax.random.normal(ks[3], (Cr,), dtype=jnp.float32),
        0.1 * jax.random.normal(ks[4], (Cr,), dtype=jnp.float32),
        0.1 * jax.random.normal(ks[5], (Cr,), dtype=jnp.float32),
        jax.random.uniform(ks[6], (Cr,), dtype=jnp.float32, minval=0.5, maxval=1.5),
    )
    bn2 = (
        1.0 + 0.1 * jax.random.normal(ks[7], (C,), dtype=jnp.float32),
        0.1 * jax.random.normal(ks[8], (C,), dtype=jnp.float32),
        0.1 * jax.random.normal(ks[9], (C,), dtype=jnp.float32),
        jax.random.uniform(ks[10], (C,), dtype=jnp.float32, minval=0.5, maxval=1.5),
    )

    out = se_module(x, w1, bn1, w2, bn2)
    out = jax.block_until_ready(out)

    expected = _reference_se(x, w1, bn1, w2, bn2)
    assert out.shape == expected.shape, (out.shape, expected.shape)
    np.testing.assert_allclose(np.asarray(out), expected, rtol=2e-3, atol=2e-3)

    print("KERNEL_OK")
</pallas_src>

<mosaic_0001>
module attributes {stable_mosaic.version = 11 : i64} {
  func.func @_se_kernel(%arg0: i32, %arg1: memref<1x32x256xf32, #tpu.memory_space<vmem>>, %arg2: memref<32x8xf32, #tpu.memory_space<vmem>>, %arg3: memref<1x8xf32, #tpu.memory_space<vmem>>, %arg4: memref<8x32xf32, #tpu.memory_space<vmem>>, %arg5: memref<1x32xf32, #tpu.memory_space<vmem>>, %arg6: memref<1x32x256xf32, #tpu.memory_space<vmem>>) attributes {dimension_semantics = [#tpu.dimension_semantics<parallel>], iteration_bounds = array<i64: 2>, scalar_prefetch = 0 : i64, scratch_operands = 0 : i64, tpu.core_type = #tpu.core_type<tc>, window_params = [{transform_indices = @transform_0, window_bounds = array<i64: 1, 32, 256>}, {pipeline_mode = #tpu.pipeline_mode<synchronous>, transform_indices = @transform_1, window_bounds = array<i64: 32, 8>}, {pipeline_mode = #tpu.pipeline_mode<synchronous>, transform_indices = @transform_2, window_bounds = array<i64: 1, 8>}, {pipeline_mode = #tpu.pipeline_mode<synchronous>, transform_indices = @transform_3, window_bounds = array<i64: 8, 32>}, {pipeline_mode = #tpu.pipeline_mode<synchronous>, transform_indices = @transform_4, window_bounds = array<i64: 1, 32>}, {transform_indices = @transform_5, window_bounds = array<i64: 1, 32, 256>}]} {
    %c0 = arith.constant 0 : index
    %c0_0 = arith.constant 0 : index
    %c0_1 = arith.constant 0 : index
    %0 = vector.load %arg1[%c0, %c0_0, %c0_1] : memref<1x32x256xf32, #tpu.memory_space<vmem>>, vector<1x32x256xf32>
    %cst = arith.constant dense<0.000000e+00> : vector<1x32xf32>
    %1 = vector.multi_reduction <add>, %0, %cst [2] : vector<1x32x256xf32> to vector<1x32xf32>
    %cst_2 = arith.constant 3.906250e-03 : f32
    %2 = vector.broadcast %cst_2 : f32 to vector<1x32xf32>
    %3 = arith.mulf %1, %2 : vector<1x32xf32>
    %c0_3 = arith.constant 0 : index
    %c0_4 = arith.constant 0 : index
    %4 = vector.load %arg2[%c0_3, %c0_4] : memref<32x8xf32, #tpu.memory_space<vmem>>, vector<32x8xf32>
    %cst_5 = arith.constant dense<0.000000e+00> : vector<1x8xf32>
    %5 = tpu.matmul %3, %4, %cst_5 {dimension_numbers = #tpu.dot_dimension_numbers<[1], [0], [0], [1], [0, 0, 1, 1], [], []>} : vector<1x32xf32>, vector<32x8xf32>, vector<1x8xf32> -> vector<1x8xf32>
    %c0_6 = arith.constant 0 : index
    %c0_7 = arith.constant 0 : index
    %6 = vector.load %arg3[%c0_6, %c0_7] : memref<1x8xf32, #tpu.memory_space<vmem>>, vector<1x8xf32>
    %7 = arith.addf %5, %6 : vector<1x8xf32>
    %cst_8 = arith.constant 0.000000e+00 : f32
    %8 = vector.broadcast %cst_8 : f32 to vector<1x8xf32>
    %9 = arith.maximumf %7, %8 : vector<1x8xf32>
    %c0_9 = arith.constant 0 : index
    %c0_10 = arith.constant 0 : index
    %10 = vector.load %arg4[%c0_9, %c0_10] : memref<8x32xf32, #tpu.memory_space<vmem>>, vector<8x32xf32>
    %cst_11 = arith.constant dense<0.000000e+00> : vector<1x32xf32>
    %11 = tpu.matmul %9, %10, %cst_11 {dimension_numbers = #tpu.dot_dimension_numbers<[1], [0], [0], [1], [0, 0, 1, 1], [], []>} : vector<1x8xf32>, vector<8x32xf32>, vector<1x32xf32> -> vector<1x32xf32>
    %c0_12 = arith.constant 0 : index
    %c0_13 = arith.constant 0 : index
    %12 = vector.load %arg5[%c0_12, %c0_13] : memref<1x32xf32, #tpu.memory_space<vmem>>, vector<1x32xf32>
    %13 = arith.addf %11, %12 : vector<1x32xf32>
    %cst_14 = arith.constant 3.000000e+00 : f32
    %14 = vector.broadcast %cst_14 : f32 to vector<1x32xf32>
    %15 = arith.addf %13, %14 : vector<1x32xf32>
    %cst_15 = arith.constant 0.000000e+00 : f32
    %cst_16 = arith.constant 6.000000e+00 : f32
    %16 = vector.broadcast %cst_15 : f32 to vector<1x32xf32>
    %17 = arith.maximumf %16, %15 : vector<1x32xf32>
    %18 = vector.broadcast %cst_16 : f32 to vector<1x32xf32>
    %19 = arith.minimumf %18, %17 : vector<1x32xf32>
    %cst_17 = arith.constant 0.166666672 : f32
    %20 = vector.broadcast %cst_17 : f32 to vector<1x32xf32>
    %21 = arith.mulf %19, %20 : vector<1x32xf32>
    %22 = vector.shape_cast %21 : vector<1x32xf32> to vector<1x32x1xf32>
    %c0_18 = arith.constant 0 : index
    %c0_19 = arith.constant 0 : index
    %c0_20 = arith.constant 0 : index
    %23 = vector.load %arg1[%c0_18, %c0_19, %c0_20] : memref<1x32x256xf32, #tpu.memory_space<vmem>>, vector<1x32x256xf32>
    %24 = vector.broadcast %22 : vector<1x32x1xf32> to vector<1x32x256xf32>
    %25 = arith.mulf %23, %24 : vector<1x32x256xf32>
    %c0_21 = arith.constant 0 : index
    %c0_22 = arith.constant 0 : index
    %c0_23 = arith.constant 0 : index
    %26 = vector.load %arg6[%c0_21, %c0_22, %c0_23] : memref<1x32x256xf32, #tpu.memory_space<vmem>>, vector<1x32x256xf32>
    tpu.vector_store %arg6[%c0_21, %c0_22, %c0_23], %25 {strides = array<i32>} : memref<1x32x256xf32, #tpu.memory_space<vmem>>, vector<1x32x256xf32>,
    return
  }
  func.func @transform_0(%arg0: i32) -> (i32, i32, i32) {
    %c0_i32 = arith.constant 0 : i32
    %c0_i32_0 = arith.constant 0 : i32
    %c0_i32_1 = arith.constant 0 : i32
    return %arg0, %c0_i32, %c0_i32_0 : i32, i32, i32
  }
  func.func @transform_1(%arg0: i32) -> (i32, i32) {
    %c0_i32 = arith.constant 0 : i32
    %c0_i32_0 = arith.constant 0 : i32
    %c0_i32_1 = arith.constant 0 : i32
    return %c0_i32, %c0_i32_0 : i32, i32
  }
  func.func @transform_2(%arg0: i32) -> (i32, i32) {
    %c0_i32 = arith.constant 0 : i32
    %c0_i32_0 = arith.constant 0 : i32
    %c0_i32_1 = arith.constant 0 : i32
    return %c0_i32, %c0_i32_0 : i32, i32
  }
  func.func @transform_3(%arg0: i32) -> (i32, i32) {
    %c0_i32 = arith.constant 0 : i32
    %c0_i32_0 = arith.constant 0 : i32
    %c0_i32_1 = arith.constant 0 : i32
    return %c0_i32, %c0_i32_0 : i32, i32
  }
  func.func @transform_4(%arg0: i32) -> (i32, i32) {
    %c0_i32 = arith.constant 0 : i32
    %c0_i32_0 = arith.constant 0 : i32
    %c0_i32_1 = arith.constant 0 : i32
    return %c0_i32, %c0_i32_0 : i32, i32
  }
  func.func @transform_5(%arg0: i32) -> (i32, i32, i32) {
    %c0_i32 = arith.constant 0 : i32
    %c0_i32_0 = arith.constant 0 : i32
    %c0_i32_1 = arith.constant 0 : i32
    return %arg0, %c0_i32, %c0_i32_0 : i32, i32, i32
  }
}

</mosaic_0001>

<bundles_post_ra>
// kernel: tpu_custom_call.1
= control target key start
LH: loop header
LB: loop body
LE: loop exit
PB: predicated region body
PF: predicated region fallthrough
CT: control target
= control target key end

     0   :  { %10 = vsyncpa [#allocation3], 0  ;;  %s1035_s0 = inlined_call_operand.hbm [shape: f32[2,32,256], index: 0, kind: input, shape index: {}]   ;;  %s1036_s1 = inlined_call_operand.vmem [shape: f32[32,8], index: 1, kind: input, shape index: {}]   ;;  %s1037_s2 = inlined_call_operand.vmem [shape: f32[1,8], index: 2, kind: input, shape index: {}]   ;;  %s1038_s3 = inlined_call_operand.vmem [shape: f32[8,32], index: 3, kind: input, shape index: {}]   ;;  %s1039_s4 = inlined_call_operand.vmem [shape: f32[1,32], index: 4, kind: input, shape index: {}]   ;;  %s1040_s5 = inlined_call_operand.hbm [shape: f32[2,32,256], index: 5, kind: output, shape index: {}]  }
   0x1   :  { %12 = vsyncpa [#allocation3 + $0x1], 0 }
   0x2   :  { %13 = vsyncpa [#allocation4], 0 }
   0x3   :  { %15 = vsyncpa [#allocation4 + $0x1], 0  ;;  %s816_s18 = smov 0   ;;  %s818_s19 = smov 0  }
   0x4   :  { %s820_s20 = smov 0   ;;  %s822_s21 = smov 0  }
   0x5 LB: > { %s837_s22 = sadd.s32 4294967295, %s775_s21   ;;  %s579_s23 = sadd.s32 4294967294, %s775_s21   ;;  %s775_s21 = sphi %s822_s21, %s1053_s21   ;;  %s771_s20 = sphi %s820_s20, %s1052_s20   ;;  %s767_s19 = sphi %s818_s19, %s1051_s19   ;;  %s763_s18 = sphi %s816_s18, %s1050_s18  }
   0x6   : > { %s841_s24 = sadd.s32 1, %s775_s21   ;;  %s28_s25 = sadd.s32 1, %s771_s20 }
   0x7   : > { %s25_s26 = ssub.s32 %s775_s21, %s841_s24  ;;  %p35_p0 = scmp.ne.s32.totalorder %s771_s20, %s767_s19 }
   0x8   : > { %p26_p1 = scmp.eq.s32.totalorder %s25_s26, 0  ;;  %p36_p2 = scmp.eq.s32.totalorder %s775_s21, 0 }
   0x9   : > { %p41_p3 = scmp.ne.s32.totalorder %s767_s19, %s763_s18  ;;  %p42_p4 = scmp.eq.s32.totalorder %s837_s22, 0 }
   0xa   : > { %s853_s27 = scalar_select %p26_p1, %s771_s20, %s28_s25  }
   0xb   : > { %p855_p5 = por %p36_p2, %p35_p0  ;;  %p859_p6 = por %p42_p4, %p41_p3 }
   0xc   : > { %p149_p7 = scmp.eq.s32.totalorder %s837_s22, 1  ;;  %p155_p8 = scmp.eq.s32.totalorder %s579_s23, 1 }
   0xd   : > { %p638_p10 = scmp.lt.s32.totalorder %s775_s21, 2  ;;  %s187_s7 = sand.u32 1, %s771_s20  }
   0xe   : > { %p866_p11 = por %p149_p7, %p35_p0  ;;  %p870_p12 = por %p155_p8, %p41_p3 }
   0xf   : > { %s595_s8 = sshll.u32 %s775_s21, 10  ;;  %s582_s9 = sshll.u32 %s187_s7, 6 }
  0x10   : > { %s1044_s30 = scalar_select %p866_p11, 1, 0 }
  0x11   : > { %s1045_s6 = scalar_select %p870_p12, 1, 0 }
  0x12   : > { %s879_s12 = scalar_lea.hbm %s1035_s0, %s595_s8  ;;  %s191_s13 = scalar_lea.vmem [#allocation2], %s582_s9 }
  0x13   : > { %s198_s14 = sshll.u32 %s191_s13, 4  ;;  %p883_p13 = pnand %p638_p10, %p855_p5  ;;  %s887_s14 = int_to_ptr.vmem [resolvable:$true] %s198_s14 }
  0x14   : > { %s889_s16 = scalar_lea.sflag [#allocation3], %s187_s7  ;;  %s679_s17 = scalar_lea.hbm %s879_s12, 1024 }
  0x15   : > { %p680_p0 = scmp.ne.s32.totalorder %s879_s12, %s679_s17  ;;  %p681_p1 = pneg %p883_p13 }
  0x16   : > { %s684_s26 = scalar_lea.hbm %s1035_s0, 2048  ;;  %p685_p4 = scmp.lt.u32.totalorder %s879_s12, %s1035_s0 }
  0x17   : > { %p682_p2 = pnand %p681_p1, %p680_p0  ;;  %p686_p5 = scmp.lt.u32.totalorder %s684_s26, %s679_s17 }
  0x18   : > { %p688_p8 = scmp.lt.u32.totalorder %s679_s17, %s879_s12 }
  0x19   : > { %p683_p3 = pneg %p682_p2  ;;  %p687_p7 = por %p686_p5, %p685_p4 }
  0x1b   : > { %p689_p10 = por %p688_p8, %p687_p7 }
  0x1d   : > { %p690_p9 = pnand %p689_p10, %p683_p3 }
  0x1f   : > { %693 = shalt.err (!%p690_p9)
}
  0x20   : > { %s694_s7 = scalar_lea.vmem %s887_s14, 1024  ;;  %s777_s9 = smov [#allocation2]  }
  0x21   : > { %p695_p0 = scmp.ne.s32.totalorder %s887_s14, %s694_s7  ;;  %s699_s10 = sshll.u32 %s777_s9, 4  ;;  %s700_s10 = int_to_ptr.vmem [resolvable:$false] %s699_s10 }
  0x22   : > { %s701_s11 = scalar_lea.vmem %s700_s10, 2048  ;;  %p702_p11 = scmp.lt.s32.totalorder %s887_s14, %s700_s10 }
  0x23   : > { %p697_p2 = pnand %p695_p0, %p681_p1  ;;  %p703_p4 = scmp.lt.s32.totalorder %s701_s11, %s694_s7 }
  0x25   : > { %p698_p12 = pneg %p697_p2  ;;  %p704_p5 = por %p703_p4, %p702_p11 }
  0x27   : > { %p705_p7 = pnand %p704_p5, %p698_p12 }
  0x29   : > { %708 = shalt.err (!%p705_p7)
}
  0x2a   : > { %s778_s13 = smov 256   ;;  %s779_s17 = smov 16  }
  0x2b   : > { %633 = dma.hbm_to_vmem [thread:$0]  (!%p883_p13), %s879_s12, 1024, %s887_s14, %s889_s16, %s778_s13, %s778_s13, %s779_s17  }
  0x2c   : > { %p585_p9 = scmp.ge.s32.totalorder %s775_s21, 1  ;;  %p206_p1 = scmp.lt.s32.totalorder %s775_s21, 3 }
  0x2e   : > { %p207_p3 = pnand %p585_p9, %p206_p1 }
  0x2f   : > { %s920_s23 = sand.u32 (!%p207_p3), 1, %s767_s19  }
  0x30   : > { %210 = sbr.rel (%p207_p3) target bundleno = 792 (0x318), region = 40  ;;  %s586_s25 = sshll.u32 (!%p207_p3), %s920_s23, 6 }
  0x31   : > { %s213_s26 = scalar_lea.sflag (!%p207_p3), [#allocation3], %s920_s23  ;;  %s216_s28 = scalar_lea.vmem (!%p207_p3), [#allocation2], %s586_s25 }
  0x37   : > { %754 = dma.done.wait (%p859_p6), %s213_s26, 1024  }
  0x38   : > { %756 = vsyncadd (%p859_p6), %s213_s26, 4294966272  ;;  %v930_v0 = vld [vmem:[%s216_s28] sm:$0xff]  ;;  %v932_v1 = vld [vmem:[%s216_s28 + $0x8] sm:$0xff]  ;;  %v780_v15 = vmov 0.0|0.0   ;;  %vm781_vm0 = vmmov 0   ;;  %v782_v19 = vmov 0.0   ;;  %v276_v20 = vlaneseq }
  0x39   : > { %v934_v2 = vld [vmem:[%s216_s28 + $0x20] sm:$0xff]  ;;  %v251_v3 = vadd.f32 %v932_v1, %v930_v0  ;;  %v938_v4 = vld [vmem:[%s216_s28 + $0x28] sm:$0xff]  ;;  %v940_v5 = vld [vmem:[%s216_s28 + $0x10] sm:$0xff]  ;;  %620 = vmatprep.subr.bf16.mxu0 %v780_v15  ;;  %612 = vmatprep.mubr.msk.f32.mxu0 %vm781_vm0, %v782_v19  ;;  %vm287_vm1 = vcmask 130112   ;;  %vm294_vm2 = vcmask 195712   ;;  %vm301_vm3 = vcmask 261312  }
  0x3a   : > { %v942_v6 = vld [vmem:[%s216_s28 + $0x18] sm:$0xff]  ;;  %v257_v7 = vadd.f32 %v938_v4, %v934_v2  ;;  %v946_v8 = vld [vmem:[%s216_s28 + $0x30] sm:$0xff]  ;;  %v267_v12 = vld [vmem:[%s1036_s1] sm:$0xff]  ;;  %615 = vmatprep.subr.mxu1 %v782_v19  ;;  %617 = vmatprep.mubr.msk.f32.mxu1 %vm781_vm0, %v782_v19  ;;  %v277_v21 = vand.u32 127, %v276_v20  ;;  %v279_v22 = vshrl.u32 %v276_v20, 7  ;;  %vm303_vm4 = vcmask 261120  }
  0x3b   : > { %v948_v9 = vld [vmem:[%s216_s28 + $0x38] sm:$0xff]  ;;  %252 = vadd.xlane.f32.xlu0 %v251_v3  ;;  %v254_v10 = vadd.f32 %v942_v6, %v940_v5  ;;  %v268_v13 = vld [vmem:[%s1036_s1 + $0x8] sm:$0xff]  ;;  %v269_v16 = vld [vmem:[%s1036_s1 + $0x10] sm:$0xff]  ;;  %vm379_vm5 = vcmask 64512   ;;  %s242_s29 = scalar_lea.vmem [#allocation5], %s586_s25  ;;  %s596_s14 = sshll.u32 %s837_s22, 10 }
  0x3c   : > { %258 = vadd.xlane.f32.xlu1 %v257_v7  ;;  %v260_v11 = vadd.f32 %v948_v9, %v946_v8  ;;  %v621_v14 = vpack.c.bf16 %v268_v13, %v267_v12  ;;  %v270_v17 = vld [vmem:[%s1036_s1 + $0x18] sm:$0xff]  ;;  %v282_v23 = vadd.s32 4294967288, %v277_v21  ;;  %v289_v25 = vadd.s32 4294967280, %v277_v21  ;;  %v377_v45 = vld [vmem:[%s1038_s3] sm:$0xff]  ;;  %s506_s12 = sshll.u32 %s242_s29, 4  ;;  %s989_s16 = scalar_lea.hbm %s1040_s5, %s596_s14  ;;  %s984_s12 = int_to_ptr.vmem [resolvable:$true] %s506_s12 }
  0x3d   : > { %v624_v18 = vpack.c.bf16 %v270_v17, %v269_v16  ;;  %v296_v26 = vadd.s32 4294967272, %v277_v21  ;;  %v280_v28 = vsub.s32 %v277_v21, %v279_v22  ;;  %616 = vmatpush3.msra.mxu1 %v377_v45  ;;  %v271_v46 = vld [vmem:[%s1037_s2] sm:$0x1]  ;;  %v459_v58 = vsub.s32 0, %v279_v22  ;;  %s493_s22 = scalar_lea.sflag [#allocation4], %s920_s23  ;;  %s709_s8 = scalar_lea.vmem %s984_s12, 1024 }
  0x3e   : > { %622 = vmatpush3.bf16.msra.mxu0 %v621_v14  ;;  %v285_v30 = vsub.s32 %v282_v23, %v279_v22  ;;  %v292_v31 = vsub.s32 %v289_v25, %v279_v22  ;;  %v378_v51 = vld [vmem:[%s1039_s4] sm:$0x1]  ;;  %p710_p6 = scmp.ne.s32.totalorder %s984_s12, %s709_s8  ;;  %p1047_p11 = scmp.ne.s32.totalorder %s1044_s30, 0 }
  0x3f   : > { %255 = vadd.xlane.f32.xlu0 %v254_v10  ;;  %623 = vmatprep.subr.bf16.mxu0 %v780_v15  ;;  %v299_v34 = vsub.s32 %v296_v26, %v279_v22  ;;  %s783_s7 = smov [#allocation5]  }
  0x40   : > { %261 = vadd.xlane.f32.xlu1 %v260_v11  ;;  %p711_p12 = pnand %p710_p6, %p1047_p11  ;;  %s713_s9 = sshll.u32 %s783_s7, 4  ;;  %s714_s9 = int_to_ptr.vmem [resolvable:$false] %s713_s9 }
  0x41   : > { %s715_s10 = scalar_lea.vmem %s714_s9, 2048  ;;  %p716_p8 = scmp.lt.s32.totalorder %s984_s12, %s714_s9 }
  0x42   : > { %625 = vmatpush3.bf16.msra.mxu0 %v624_v18  ;;  %p712_p13 = pneg %p711_p12  ;;  %p717_p10 = scmp.lt.s32.totalorder %s715_s10, %s709_s8 }
  0x44   : > { %p718_p0 = por %p717_p10, %p716_p8 }
  0x46   : > { %p719_p2 = pnand %p718_p0, %p712_p13 }
  0xc8   : > { %v253_v24 = vpop.xlane.xlu0 %252 }
  0xc9   : > { %v259_v27 = vpop.xlane.xlu1 %258  ;;  %v263_v29 = vmul.f32 0.00390625, %v253_v24 }
  0xca   : > { %v265_v32 = vmul.f32 0.00390625, %v259_v27 }
  0xcb   : > { %v281_v38 = vrot.slane %v263_v29, %v280_v28 }
  0xcc   : > { %v256_v33 = vpop.xlane.xlu0 %255  ;;  %v293_v40 = vrot.slane %v265_v32, %v292_v31 }
  0xcd   : > { %v264_v35 = vmul.f32 0.00390625, %v256_v33  ;;  %v262_v36 = vpop.xlane.xlu1 %261 }
  0xce   : > { %v266_v37 = vmul.f32 0.00390625, %v262_v36 }
  0xcf   : > { %v286_v39 = vrot.slane %v264_v35, %v285_v30 }
  0xd0   : > { %v300_v41 = vrot.slane %v266_v37, %v299_v34 }
  0xd1   : > { %v288_v42 = vsel %vm287_vm1, %v286_v39, %v281_v38 }
  0xd2   : > { %v295_v43 = vsel %vm294_vm2, %v293_v40, %v288_v42 }
  0xd3   : > { %v302_v44 = vsel %vm301_vm3, %v300_v41, %v295_v43 }
  0xd4   : > { %613 = vmatmul.mubr.msk.f32.vlgmr.msra.gmra.mrb[0].mxu0 %vm303_vm4, %v302_v44 }
 0x1a7   : > { %v372_v47 = vpop.f32.mrb[0].mxu0 }
 0x1a8   : > { %v373_v48 = vadd.f32 %v372_v47, %v271_v46  ;;  %v614_v49 = vpop.f32.mrb[1].mxu0 }
 0x1aa   : > { %v376_v50 = vmax.f32 %v373_v48, 0.0 }
 0x1ac   : > { %618 = vmatmul.mubr.msk.f32.vlgmr.msra.gmra.mrb[0].mxu1 %vm379_vm5, %v376_v50 }
 0x27f   : > { %v449_v52 = vpop.f32.mrb[0].mxu1 }
 0x280   : > { %v450_v53 = vadd.f32 %v449_v52, %v378_v51  ;;  %v619_v54 = vpop.f32.mrb[1].mxu1 }
 0x282   : > { %v453_v55 = vadd.f32 3.0, %v450_v53 }
 0x284   : > { %v454_v56 = vmax.f32 %v453_v55, 0.0 }
 0x286   : > { %v455_v57 = vmin.f32 %v454_v56, 6.0 }
 0x288   : > { %v456_v59 = vmul.f32 0.16666667, %v455_v57 }
 0x28a   : > { %v460_v60 = vrot.slane %v456_v59, %v459_v58 }
 0x28c   : > { %466 = vbcast.lane.b32.xlu1 %v460_v60, 264  ;;  %462 = vbcast.lane.b32.xlu0 %v460_v60, 256 }
 0x290   : > { %470 = vbcast.lane.b32.xlu1 %v460_v60, 272 }
 0x294   : > { %474 = vbcast.lane.b32.xlu1 %v460_v60, 280 }
 0x2fe   : > { %v467_v61 = vpop.permute.xlu1 %466  ;;  %v463_v62 = vpop.permute.xlu0 %462 }
 0x2ff   : > { %v478_v63 = vmul.f32 %v467_v61, %v940_v5  ;;  %v479_v3 = vmul.f32 %v467_v61, %v942_v6  ;;  %v476_v7 = vmul.f32 %v463_v62, %v930_v0  ;;  %v477_v10 = vmul.f32 %v463_v62, %v932_v1 }
 0x301   : > { %486 = vst [vmem:[%s242_s29 + $0x10] sm:$0xff] %v478_v63  ;;  %487 = vst [vmem:[%s242_s29 + $0x18] sm:$0xff] %v479_v3 }
 0x302   : > { %484 = vst [vmem:[%s242_s29] sm:$0xff] %v476_v7  ;;  %485 = vst [vmem:[%s242_s29 + $0x8] sm:$0xff] %v477_v10  ;;  %v471_v11 = vpop.permute.xlu1 %470 }
 0x303   : > { %v480_v12 = vmul.f32 %v471_v11, %v934_v2  ;;  %v481_v5 = vmul.f32 %v471_v11, %v938_v4 }
 0x305   : > { %488 = vst [vmem:[%s242_s29 + $0x20] sm:$0xff] %v480_v12  ;;  %489 = vst [vmem:[%s242_s29 + $0x28] sm:$0xff] %v481_v5 }
 0x306   : > { %v475_v0 = vpop.permute.xlu1 %474 }
 0x307   : > { %v482_v1 = vmul.f32 %v475_v0, %v946_v8  ;;  %v483_v2 = vmul.f32 %v475_v0, %v948_v9 }
 0x309   : > { %490 = vst [vmem:[%s242_s29 + $0x30] sm:$0xff] %v482_v1  ;;  %491 = vst [vmem:[%s242_s29 + $0x38] sm:$0xff] %v483_v2 }
 0x30a   : > { %722 = shalt.err (!%p719_p2)
}
 0x30b   : > { %s723_s11 = scalar_lea.hbm %s989_s16, 1024  ;;  %s727_s26 = scalar_lea.hbm %s1040_s5, 2048 }
 0x30c   : > { %p724_p4 = scmp.ne.s32.totalorder %s989_s16, %s723_s11  ;;  %p728_p9 = scmp.lt.u32.totalorder %s989_s16, %s1040_s5 }
 0x30d   : > { %p729_p1 = scmp.lt.u32.totalorder %s727_s26, %s723_s11  ;;  %p731_p6 = scmp.lt.u32.totalorder %s723_s11, %s989_s16 }
 0x30e   : > { %p725_p5 = pnand %p724_p4, %p1047_p11 }
 0x30f   : > { %p730_p3 = por %p729_p1, %p728_p9 }
 0x310   : > { %p726_p7 = pneg %p725_p5 }
 0x311   : > { %p732_p12 = por %p731_p6, %p730_p3 }
 0x313   : > { %p733_p13 = pnand %p732_p12, %p726_p7 }
 0x315   : > { %736 = shalt.err (!%p733_p13)
}
 0x316   : > { %s784_s14 = smov 256   ;;  %s785_s25 = smov 16  }
 0x317   : > { %628 = dma.vmem_to_hbm [thread:$0]  (%p1047_p11), %s984_s12, 1024, %s989_s16, %s493_s22, %s784_s14, %s784_s14, %s785_s25  }
 0x318 PF: > { %s521_s15 = sand.u32 1, %s763_s18   ;;  %p1048_p8 = scmp.ne.s32.totalorder %s1045_s6, 0 }
 0x319   : > { %p1049_p10 = scmp.ge.s32.totalorder %s775_s21, 2  ;;  %s522_s8 = scalar_lea.sflag [#allocation4], %s521_s15 }
 0x31b   : > { %p635_p0 = pnand %p1049_p10, %p1048_p8 }
 0x31d   : > { %758 = dma.done.wait (!%p635_p0), %s522_s8, 1024  }
 0x31e   : > { %760 = vsyncadd (!%p635_p0), %s522_s8, 4294966272  ;;  %p18_p2 = scmp.ge.s32.totalorder %s841_s24, 4   ;;  %s1050_s18 = smov %s767_s19 }
 0x31f   : > { %s1051_s19 = smov %s771_s20  ;;  %s1052_s20 = smov %s853_s27 }
 0x320   : > { %s1053_s21 = smov %s841_s24  ;;  %20 = sbr.rel (!%p18_p2) target bundleno = 5 (0x5), region = 85 }
 0x327   :  { %527 = vsyncpa [#allocation3], 1 }
 0x328   :  { %529 = vsyncpa [#allocation3 + $0x1], 1 }
 0x329   :  { %530 = vsyncpa [#allocation4], 1 }
 0x32a   :  { %532 = vsyncpa [#allocation4 + $0x1], 1 }

</bundles_post_ra>
